<compile_context>
chip_gen: v7x
topology: tpu7x:2x2x1
jax: 0.10.0
libtpu: 0.0.40
codegen_flags: <defaults>
</compile_context>

<pallas_src>
import jax
import jax.numpy as jnp
from jax.experimental import pallas as pl
from jax.experimental.pallas import tpu as pltpu


def attmat_kernel(obj_ref, hog_ref,
                  w_obj_ref,
                  w_rd1_ref, b_rd1_ref,
                  w_rd2_ref, b_rd2_ref,
                  w1h_ref, b1_ref,
                  w2_ref, b2_ref,
                  out_ref):
    f32 = jnp.float32
    bf16 = jnp.bfloat16

    # ---- Object branch (fully folded) ---------------------------------------
    # pool + trunk stub + resnet.fc + fc1_m1[:, :54] folded offline into one
    # (CHW, 20) bf16 weight; in-kernel cast so the obj stream is read once.
    obj = obj_ref[...].astype(bf16)                                    # (TB, CHW)
    m = jnp.dot(obj, w_obj_ref[...], preferred_element_type=f32)       # (TB, 20)

    # ---- HOG branch ----------------------------------------------------------
    hog = hog_ref[...].astype(bf16)                                    # (TB, 324)
    h = jnp.dot(hog, w_rd1_ref[...], preferred_element_type=f32) + b_rd1_ref[...]
    h = jnp.maximum(h, 0.0).astype(bf16)                               # (TB, 100)
    h = jnp.dot(h, w_rd2_ref[...], preferred_element_type=f32) + b_rd2_ref[...]
    h = jnp.maximum(h, 0.0).astype(bf16)                               # (TB, 60)

    # ---- Head ----------------------------------------------------------------
    # fc1_m1(concat([nodes, h], 1)) == folded-obj term + h @ W1[54:] + b1_folded
    m = m + jnp.dot(h, w1h_ref[...], preferred_element_type=f32) + b1_ref[...]
    m = jnp.maximum(m, 0.0).astype(bf16)                               # (TB, 20)
    m = jnp.dot(m, w2_ref[...], preferred_element_type=f32) + b2_ref[...]
    out_ref[...] = jax.nn.sigmoid(m)                                   # (TB, 3) f32


def _linear_params(key, fan_in, fan_out):
    """Deterministic torch-style Linear init; weight stored as (in, out)."""
    kw, kb = jax.random.split(key)
    bound = 1.0 / jnp.sqrt(jnp.float32(fan_in))
    w = jax.random.uniform(kw, (fan_in, fan_out), jnp.float32, -bound, bound)
    b = jax.random.uniform(kb, (1, fan_out), jnp.float32, -bound, bound)
    return w, b


def make_params(seed=0):
    keys = jax.random.split(jax.random.PRNGKey(seed), 6)
    # Stand-in projection for the (frozen) ResNet50 conv trunk: 3 -> 2048.
    w_stub = jax.random.normal(keys[0], (3, 2048), jnp.float32) * 0.02
    w_fc, b_fc = _linear_params(keys[1], 2048, 54)     # resnet.resnet.fc
    w_rd1, b_rd1 = _linear_params(keys[2], 324, 100)   # reduce_dim1
    w_rd2, b_rd2 = _linear_params(keys[3], 100, 60)    # reduce_dim2
    w1, b1 = _linear_params(keys[4], 114, 20)          # fc1_m1 (feature_dim = 114)
    w2, b2 = _linear_params(keys[5], 20, 3)            # fc2_m1
    return dict(w_stub=w_stub, w_fc=w_fc, b_fc=b_fc,
                w_rd1=w_rd1, b_rd1=b_rd1, w_rd2=w_rd2, b_rd2=b_rd2,
                w1n=w1[:54, :], w1h=w1[54:, :], b1=b1, w2=w2, b2=b2)


def attmat_forward(obj_patch, hog_feature, p, *, tb=None):
    B, C, H, W = obj_patch.shape
    HW = H * W
    CHW = C * HW

    # Free, lane-dense views.  NO wrapper dtype cast: the kernel reads f32
    # directly and casts to bf16 in VMEM (avoids an extra XLA pass over the
    # dominant obj stream; a bf16/lane-padded producer would halve it again).
    obj2d = obj_patch.reshape(B, CHW)
    hog = hog_feature
    nhog = hog.shape[1]

    # ---- Offline weight folding (exact; done once per parameter set) --------
    # Block-diagonal average-pool matrix: column c has 1/HW over channel-c rows.
    pool_w = jnp.kron(jnp.eye(C, dtype=jnp.float32),
                      jnp.ones((HW, 1), jnp.float32)) / HW              # (CHW, C)
    w_obj = (pool_w @ p["w_stub"] @ p["w_fc"] @ p["w1n"]).astype(jnp.bfloat16)
    b1f = p["b1"] + p["b_fc"] @ p["w1n"]                                # (1, 20) f32

    weights = (w_obj,
               p["w_rd1"].astype(jnp.bfloat16), p["b_rd1"],
               p["w_rd2"].astype(jnp.bfloat16), p["b_rd2"],
               p["w1h"].astype(jnp.bfloat16), b1f,
               p["w2"].astype(jnp.bfloat16), p["b2"])

    # ---- Batch tiling --------------------------------------------------------
    try:
        vmem_cap = int(pltpu.get_tpu_info().vmem_capacity_bytes)
    except Exception:
        vmem_cap = 64 << 20                               # v7x-conservative fallback
    big_vmem = vmem_cap > (96 << 20)                      # v5e/v6e: 128 MiB, v7x: 64 MiB

    if tb is None:
        target_tile_bytes = (16 << 20) if big_vmem else (8 << 20)
        tb_cap = 4096 if big_vmem else 2048
        row_bytes = CHW * 4                               # f32 obj rows dominate
        tb = target_tile_bytes // max(1, row_bytes)
        tb = max(16, min(tb_cap, (tb // 16) * 16))        # multiple of 16 (bf16 packing)
        if B >= 32:
            # Keep >= 2 grid steps so both v7x TensorCores (megacore) get work.
            tb = min(tb, ((pl.cdiv(B, 2) + 15) // 16) * 16)
    if tb > B:
        tb = B                                            # tiny batch: one full tile
    grid = (pl.cdiv(B, tb),)

    def resident(a):
        nd = a.ndim
        return pl.BlockSpec(a.shape, lambda i, _nd=nd: (0,) * _nd)

    in_specs = ([pl.BlockSpec((tb, CHW), lambda i: (i, 0)),
                 pl.BlockSpec((tb, nhog), lambda i: (i, 0))]
                + [resident(w) for w in weights])
    out_specs = pl.BlockSpec((tb, 3), lambda i: (i, 0))

    # Advisory cost estimate so XLA schedules neighbors around this DMA-bound call.
    flops = 2 * B * (CHW * 20 + nhog * 100 + 100 * 60 + 60 * 20 + 20 * 3)
    bytes_accessed = (int(obj2d.size) * 4 + int(hog.size) * 4
                      + sum(int(w.size) * w.dtype.itemsize for w in weights)
                      + B * 3 * 4)
    cost = pl.CostEstimate(flops=flops, transcendentals=B * 3,
                           bytes_accessed=bytes_accessed)

    # VMEM budget: double-buffered f32 I/O tiles + in-kernel bf16 copies of the
    # activation tiles + resident weights, with 2x headroom; clamped to capacity.
    tile_bytes = 2 * (tb * CHW * 4 + tb * nhog * 4 + tb * 3 * 4)
    cast_bytes = tb * (CHW + nhog) * 2
    weight_bytes = sum(int(w.size) * w.dtype.itemsize for w in weights)
    vmem_limit = int(min(vmem_cap,
                         max(32 << 20, 2 * (tile_bytes + cast_bytes + weight_bytes))))

    return pl.pallas_call(
        attmat_kernel,
        out_shape=jax.ShapeDtypeStruct((B, 3), jnp.float32),
        grid=grid,
        in_specs=in_specs,
        out_specs=out_specs,
        cost_estimate=cost,
        compiler_params=pltpu.CompilerParams(
            dimension_semantics=("parallel",),   # shards batch tiles across TCs on v7x
            vmem_limit_bytes=vmem_limit),
    )(obj2d, hog, *weights)


def attmat_reference(obj_patch, hog_feature, p):
    """Pure-JAX f32 reference (un-folded object branch) — checks the folding."""
    B, C, H, W = obj_patch.shape
    pooled = jnp.mean(obj_patch.reshape(B, C, H * W), axis=-1)
    feat = pooled @ p["w_stub"]
    nodes = feat @ p["w_fc"] + p["b_fc"]
    h = jnp.maximum(hog_feature @ p["w_rd1"] + p["b_rd1"], 0.0)
    h = jnp.maximum(h @ p["w_rd2"] + p["b_rd2"], 0.0)
    m = jnp.maximum(nodes @ p["w1n"] + h @ p["w1h"] + p["b1"], 0.0)
    m = m @ p["w2"] + p["b2"]
    return jax.nn.sigmoid(m)


if __name__ == "__main__":
    key = jax.random.PRNGKey(0)
    k_obj, k_hog = jax.random.split(key)
    B, H, W = 2, 16, 16
    obj_patch = jax.random.normal(k_obj, (B, 3, H, W), jnp.float32)   # NCHW
    hog_feature = jax.random.normal(k_hog, (B, 324), jnp.float32)     # 162*2

    params = make_params(seed=0)

    out = attmat_forward(obj_patch, hog_feature, params)
    out = jax.block_until_ready(out)

    ref = attmat_reference(obj_patch, hog_feature, params)
    assert out.shape == (B, 3)
    # bf16 MXU operands -> relaxed tolerance vs the f32 reference.
    assert bool(jnp.allclose(out, ref, atol=1e-2, rtol=1e-2)), (out, ref)
    print("KERNEL_OK")
</pallas_src>

<mosaic_0001>
module attributes {stable_mosaic.version = 11 : i64} {
  func.func @attmat_kernel(%arg0: i32, %arg1: memref<2x768xf32, #tpu.memory_space<vmem>>, %arg2: memref<2x324xf32, #tpu.memory_space<vmem>>, %arg3: memref<768x20xbf16, #tpu.memory_space<vmem>>, %arg4: memref<324x100xbf16, #tpu.memory_space<vmem>>, %arg5: memref<1x100xf32, #tpu.memory_space<vmem>>, %arg6: memref<100x60xbf16, #tpu.memory_space<vmem>>, %arg7: memref<1x60xf32, #tpu.memory_space<vmem>>, %arg8: memref<60x20xbf16, #tpu.memory_space<vmem>>, %arg9: memref<1x20xf32, #tpu.memory_space<vmem>>, %arg10: memref<20x3xbf16, #tpu.memory_space<vmem>>, %arg11: memref<1x3xf32, #tpu.memory_space<vmem>>, %arg12: memref<2x3xf32, #tpu.memory_space<vmem>>) attributes {dimension_semantics = [#tpu.dimension_semantics<parallel>], iteration_bounds = array<i64: 1>, scalar_prefetch = 0 : i64, scratch_operands = 0 : i64, tpu.core_type = #tpu.core_type<tc>, window_params = [{transform_indices = @transform_0, window_bounds = array<i64: 2, 768>}, {transform_indices = @transform_1, window_bounds = array<i64: 2, 324>}, {pipeline_mode = #tpu.pipeline_mode<synchronous>, transform_indices = @transform_2, window_bounds = array<i64: 768, 20>}, {pipeline_mode = #tpu.pipeline_mode<synchronous>, transform_indices = @transform_3, window_bounds = array<i64: 324, 100>}, {pipeline_mode = #tpu.pipeline_mode<synchronous>, transform_indices = @transform_4, window_bounds = array<i64: 1, 100>}, {pipeline_mode = #tpu.pipeline_mode<synchronous>, transform_indices = @transform_5, window_bounds = array<i64: 100, 60>}, {pipeline_mode = #tpu.pipeline_mode<synchronous>, transform_indices = @transform_6, window_bounds = array<i64: 1, 60>}, {pipeline_mode = #tpu.pipeline_mode<synchronous>, transform_indices = @transform_7, window_bounds = array<i64: 60, 20>}, {pipeline_mode = #tpu.pipeline_mode<synchronous>, transform_indices = @transform_8, window_bounds = array<i64: 1, 20>}, {pipeline_mode = #tpu.pipeline_mode<synchronous>, transform_indices = @transform_9, window_bounds = array<i64: 20, 3>}, {pipeline_mode = #tpu.pipeline_mode<synchronous>, transform_indices = @transform_10, window_bounds = array<i64: 1, 3>}, {transform_indices = @transform_11, window_bounds = array<i64: 2, 3>}]} {
    %c0 = arith.constant 0 : index
    %c0_0 = arith.constant 0 : index
    %0 = vector.load %arg1[%c0, %c0_0] : memref<2x768xf32, #tpu.memory_space<vmem>>, vector<2x768xf32>
    %1 = arith.truncf %0 : vector<2x768xf32> to vector<2x768xbf16>
    %c0_1 = arith.constant 0 : index
    %c0_2 = arith.constant 0 : index
    %2 = vector.load %arg3[%c0_1, %c0_2] : memref<768x20xbf16, #tpu.memory_space<vmem>>, vector<768x20xbf16>
    %cst = arith.constant dense<0.000000e+00> : vector<2x20xf32>
    %3 = tpu.matmul %1, %2, %cst {dimension_numbers = #tpu.dot_dimension_numbers<[1], [0], [0], [1], [0, 0, 1, 1], [], []>} : vector<2x768xbf16>, vector<768x20xbf16>, vector<2x20xf32> -> vector<2x20xf32>
    %c0_3 = arith.constant 0 : index
    %c0_4 = arith.constant 0 : index
    %4 = vector.load %arg2[%c0_3, %c0_4] : memref<2x324xf32, #tpu.memory_space<vmem>>, vector<2x324xf32>
    %5 = arith.truncf %4 : vector<2x324xf32> to vector<2x324xbf16>
    %c0_5 = arith.constant 0 : index
    %c0_6 = arith.constant 0 : index
    %6 = vector.load %arg4[%c0_5, %c0_6] : memref<324x100xbf16, #tpu.memory_space<vmem>>, vector<324x100xbf16>
    %cst_7 = arith.constant dense<0.000000e+00> : vector<2x100xf32>
    %7 = tpu.matmul %5, %6, %cst_7 {dimension_numbers = #tpu.dot_dimension_numbers<[1], [0], [0], [1], [0, 0, 1, 1], [], []>} : vector<2x324xbf16>, vector<324x100xbf16>, vector<2x100xf32> -> vector<2x100xf32>
    %c0_8 = arith.constant 0 : index
    %c0_9 = arith.constant 0 : index
    %8 = vector.load %arg5[%c0_8, %c0_9] : memref<1x100xf32, #tpu.memory_space<vmem>>, vector<1x100xf32>
    %9 = vector.broadcast %8 : vector<1x100xf32> to vector<2x100xf32>
    %10 = arith.addf %7, %9 : vector<2x100xf32>
    %cst_10 = arith.constant 0.000000e+00 : f32
    %11 = vector.broadcast %cst_10 : f32 to vector<2x100xf32>
    %12 = arith.maximumf %10, %11 : vector<2x100xf32>
    %13 = arith.truncf %12 : vector<2x100xf32> to vector<2x100xbf16>
    %c0_11 = arith.constant 0 : index
    %c0_12 = arith.constant 0 : index
    %14 = vector.load %arg6[%c0_11, %c0_12] : memref<100x60xbf16, #tpu.memory_space<vmem>>, vector<100x60xbf16>
    %cst_13 = arith.constant dense<0.000000e+00> : vector<2x60xf32>
    %15 = tpu.matmul %13, %14, %cst_13 {dimension_numbers = #tpu.dot_dimension_numbers<[1], [0], [0], [1], [0, 0, 1, 1], [], []>} : vector<2x100xbf16>, vector<100x60xbf16>, vector<2x60xf32> -> vector<2x60xf32>
    %c0_14 = arith.constant 0 : index
    %c0_15 = arith.constant 0 : index
    %16 = vector.load %arg7[%c0_14, %c0_15] : memref<1x60xf32, #tpu.memory_space<vmem>>, vector<1x60xf32>
    %17 = vector.broadcast %16 : vector<1x60xf32> to vector<2x60xf32>
    %18 = arith.addf %15, %17 : vector<2x60xf32>
    %cst_16 = arith.constant 0.000000e+00 : f32
    %19 = vector.broadcast %cst_16 : f32 to vector<2x60xf32>
    %20 = arith.maximumf %18, %19 : vector<2x60xf32>
    %21 = arith.truncf %20 : vector<2x60xf32> to vector<2x60xbf16>
    %c0_17 = arith.constant 0 : index
    %c0_18 = arith.constant 0 : index
    %22 = vector.load %arg8[%c0_17, %c0_18] : memref<60x20xbf16, #tpu.memory_space<vmem>>, vector<60x20xbf16>
    %cst_19 = arith.constant dense<0.000000e+00> : vector<2x20xf32>
    %23 = tpu.matmul %21, %22, %cst_19 {dimension_numbers = #tpu.dot_dimension_numbers<[1], [0], [0], [1], [0, 0, 1, 1], [], []>} : vector<2x60xbf16>, vector<60x20xbf16>, vector<2x20xf32> -> vector<2x20xf32>
    %24 = arith.addf %3, %23 : vector<2x20xf32>
    %c0_20 = arith.constant 0 : index
    %c0_21 = arith.constant 0 : index
    %25 = vector.load %arg9[%c0_20, %c0_21] : memref<1x20xf32, #tpu.memory_space<vmem>>, vector<1x20xf32>
    %26 = vector.broadcast %25 : vector<1x20xf32> to vector<2x20xf32>
    %27 = arith.addf %24, %26 : vector<2x20xf32>
    %cst_22 = arith.constant 0.000000e+00 : f32
    %28 = vector.broadcast %cst_22 : f32 to vector<2x20xf32>
    %29 = arith.maximumf %27, %28 : vector<2x20xf32>
    %30 = arith.truncf %29 : vector<2x20xf32> to vector<2x20xbf16>
    %c0_23 = arith.constant 0 : index
    %c0_24 = arith.constant 0 : index
    %31 = vector.load %arg10[%c0_23, %c0_24] : memref<20x3xbf16, #tpu.memory_space<vmem>>, vector<20x3xbf16>
    %cst_25 = arith.constant dense<0.000000e+00> : vector<2x3xf32>
    %32 = tpu.matmul %30, %31, %cst_25 {dimension_numbers = #tpu.dot_dimension_numbers<[1], [0], [0], [1], [0, 0, 1, 1], [], []>} : vector<2x20xbf16>, vector<20x3xbf16>, vector<2x3xf32> -> vector<2x3xf32>
    %c0_26 = arith.constant 0 : index
    %c0_27 = arith.constant 0 : index
    %33 = vector.load %arg11[%c0_26, %c0_27] : memref<1x3xf32, #tpu.memory_space<vmem>>, vector<1x3xf32>
    %34 = vector.broadcast %33 : vector<1x3xf32> to vector<2x3xf32>
    %35 = arith.addf %32, %34 : vector<2x3xf32>
    %36 = arith.negf %35 : vector<2x3xf32>
    %37 = math.exp %36 : vector<2x3xf32>
    %cst_28 = arith.constant 1.000000e+00 : f32
    %38 = vector.broadcast %cst_28 : f32 to vector<2x3xf32>
    %39 = arith.addf %38, %37 : vector<2x3xf32>
    %40 = arith.divf %38, %39 : vector<2x3xf32>
    %c0_29 = arith.constant 0 : index
    %c0_30 = arith.constant 0 : index
    %41 = vector.load %arg12[%c0_29, %c0_30] : memref<2x3xf32, #tpu.memory_space<vmem>>, vector<2x3xf32>
    tpu.vector_store %arg12[%c0_29, %c0_30], %40 {strides = array<i32>} : memref<2x3xf32, #tpu.memory_space<vmem>>, vector<2x3xf32>,
    return
  }
  func.func @transform_0(%arg0: i32) -> (i32, i32) {
    %c0_i32 = arith.constant 0 : i32
    %c0_i32_0 = arith.constant 0 : i32
    return %arg0, %c0_i32 : i32, i32
  }
  func.func @transform_1(%arg0: i32) -> (i32, i32) {
    %c0_i32 = arith.constant 0 : i32
    %c0_i32_0 = arith.constant 0 : i32
    return %arg0, %c0_i32 : i32, i32
  }
  func.func @transform_2(%arg0: i32) -> (i32, i32) {
    %c0_i32 = arith.constant 0 : i32
    %c0_i32_0 = arith.constant 0 : i32
    %c0_i32_1 = arith.constant 0 : i32
    return %c0_i32, %c0_i32_0 : i32, i32
  }
  func.func @transform_3(%arg0: i32) -> (i32, i32) {
    %c0_i32 = arith.constant 0 : i32
    %c0_i32_0 = arith.constant 0 : i32
    %c0_i32_1 = arith.constant 0 : i32
    return %c0_i32, %c0_i32_0 : i32, i32
  }
  func.func @transform_4(%arg0: i32) -> (i32, i32) {
    %c0_i32 = arith.constant 0 : i32
    %c0_i32_0 = arith.constant 0 : i32
    %c0_i32_1 = arith.constant 0 : i32
    return %c0_i32, %c0_i32_0 : i32, i32
  }
  func.func @transform_5(%arg0: i32) -> (i32, i32) {
    %c0_i32 = arith.constant 0 : i32
    %c0_i32_0 = arith.constant 0 : i32
    %c0_i32_1 = arith.constant 0 : i32
    return %c0_i32, %c0_i32_0 : i32, i32
  }
  func.func @transform_6(%arg0: i32) -> (i32, i32) {
    %c0_i32 = arith.constant 0 : i32
    %c0_i32_0 = arith.constant 0 : i32
    %c0_i32_1 = arith.constant 0 : i32
    return %c0_i32, %c0_i32_0 : i32, i32
  }
  func.func @transform_7(%arg0: i32) -> (i32, i32) {
    %c0_i32 = arith.constant 0 : i32
    %c0_i32_0 = arith.constant 0 : i32
    %c0_i32_1 = arith.constant 0 : i32
    return %c0_i32, %c0_i32_0 : i32, i32
  }
  func.func @transform_8(%arg0: i32) -> (i32, i32) {
    %c0_i32 = arith.constant 0 : i32
    %c0_i32_0 = arith.constant 0 : i32
    %c0_i32_1 = arith.constant 0 : i32
    return %c0_i32, %c0_i32_0 : i32, i32
  }
  func.func @transform_9(%arg0: i32) -> (i32, i32) {
    %c0_i32 = arith.constant 0 : i32
    %c0_i32_0 = arith.constant 0 : i32
    %c0_i32_1 = arith.constant 0 : i32
    return %c0_i32, %c0_i32_0 : i32, i32
  }
  func.func @transform_10(%arg0: i32) -> (i32, i32) {
    %c0_i32 = arith.constant 0 : i32
    %c0_i32_0 = arith.constant 0 : i32
    %c0_i32_1 = arith.constant 0 : i32
    return %c0_i32, %c0_i32_0 : i32, i32
  }
  func.func @transform_11(%arg0: i32) -> (i32, i32) {
    %c0_i32 = arith.constant 0 : i32
    %c0_i32_0 = arith.constant 0 : i32
    return %arg0, %c0_i32 : i32, i32
  }
}

</mosaic_0001>

<bundles_post_ra>
// kernel: tpu_custom_call.1
= control target key start
LH: loop header
LB: loop body
LE: loop exit
PB: predicated region body
PF: predicated region fallthrough
CT: control target
= control target key end

     0   :  { %v1525_v2 = vmov 0.0   ;;  %vm1526_vm0 = vmmov 0   ;;  %v48_v16 = vlaneseq  ;;  %vm376_vm1 = vcmask 1041408   ;;  %s1903_s0 = inlined_call_operand.vmem [shape: f32[2,768], index: 0, kind: input, shape index: {}]   ;;  %s1904_s1 = inlined_call_operand.vmem [shape: f32[2,324], index: 1, kind: input, shape index: {}]   ;;  %s1905_s2 = inlined_call_operand.vmem [shape: bf16[768,20], index: 2, kind: input, shape index: {}]   ;;  %s1906_s3 = inlined_call_operand.vmem [shape: bf16[324,100], index: 3, kind: input, shape index: {}]   ;;  %s1907_s4 = inlined_call_operand.vmem [shape: f32[1,100], index: 4, kind: input, shape index: {}]   ;;  %s1908_s5 = inlined_call_operand.vmem [shape: bf16[100,60], index: 5, kind: input, shape index: {}]   ;;  %s1909_s6 = inlined_call_operand.vmem [shape: f32[1,60], index: 6, kind: input, shape index: {}]   ;;  %s1910_s7 = inlined_call_operand.vmem [shape: bf16[60,20], index: 7, kind: input, shape index: {}]   ;;  %s1911_s8 = inlined_call_operand.vmem [shape: f32[1,20], index: 8, kind: input, shape index: {}]   ;;  %s1912_s9 = inlined_call_operand.vmem [shape: bf16[20,3], index: 9, kind: input, shape index: {}]   ;;  %s1913_s10 = inlined_call_operand.vmem [shape: f32[1,3], index: 10, kind: input, shape index: {}]   ;;  %s1914_s11 = inlined_call_operand.hbm [shape: f32[2,3], index: 11, kind: output, shape index: {}]  }
   0x1   :  { %v1413_v0 = vld [vmem:[%s1906_s3 + $0x40] sm:$0xff]   ;;  %1357 = vmatprep.subr.bf16.mxu1 %v1525_v2  ;;  %v1415_v3 = vld [vmem:[%s1906_s3 + $0x48] sm:$0xff]   ;;  %v1417_v5 = vld [vmem:[%s1906_s3 + $0x50] sm:$0xff]   ;;  %1367 = vmatprep.mubr.msk.bf16.mxu1 %vm1526_vm0, %v1525_v2  ;;  %v1527_v20 = vmov 1983009808   ;;  %vm372_vm2 = vcmask 556032  }
   0x2   :  { %v1414_v1 = vld [vmem:[%s1906_s3] sm:$0xff]   ;;  %1247 = vmatprep.subr.bf16.mxu0 %v1413_v0  ;;  %v1416_v4 = vld [vmem:[%s1906_s3 + $0x8] sm:$0xff]   ;;  %v1418_v6 = vld [vmem:[%s1906_s3 + $0x10] sm:$0xff]   ;;  %v46_v21 = vunpack.c.l.s4 %v1527_v20  ;;  %v49_v22 = vshrl.u32 %v48_v16, 7 }
   0x3   :  { %1248 = vmatpush3.bf16.msra.mxu0 %v1414_v1  ;;  %v1419_v7 = vld [vmem:[%s1906_s3 + $0x58] sm:$0xff]   ;;  %v1421_v8 = vld [vmem:[%s1906_s3 + $0x80] sm:$0xff]   ;;  %v1424_v10 = vld [vmem:[%s1906_s3 + $0x88] sm:$0xff]  }
   0x4   :  { %1249 = vmatprep.subr.bf16.mxu0 %v1415_v3  ;;  %v1420_v9 = vld [vmem:[%s1906_s3 + $0x18] sm:$0xff]   ;;  %1358 = vmatpush3.bf16.msra.mxu1 %v1421_v8  ;;  %v1422_v11 = vld [vmem:[%s1906_s3 + $0x60] sm:$0xff]   ;;  %v1427_v12 = vld [vmem:[%s1906_s3 + $0x90] sm:$0xff]   ;;  %v47_v25 = vunpack.c.0.s8 %v46_v21 }
   0x5   :  { %1359 = vmatprep.subr.bf16.mxu1 %v1525_v2  ;;  %v1423_v13 = vld [vmem:[%s1906_s3 + $0x20] sm:$0xff]   ;;  %v1425_v14 = vld [vmem:[%s1906_s3 + $0x68] sm:$0xff]   ;;  %v1430_v17 = vld [vmem:[%s1906_s3 + $0x98] sm:$0xff]  }
   0x6   :  { %v1426_v15 = vld [vmem:[%s1906_s3 + $0x28] sm:$0xff]   ;;  %v1428_v18 = vld [vmem:[%s1906_s3 + $0x70] sm:$0xff]   ;;  %v177_v19 = vld [vmem:[%s1904_s1] sm:$0x3f]  ;;  %v1663_v30 = vsub.s32 %v47_v25, %v49_v22 }
   0x7   :  { %1250 = vmatpush3.bf16.msra.mxu0 %v1416_v4  ;;  %v1434_v23 = vld [vmem:[%s1906_s3 + $0xa0] ss:$0 sps:$4 sm:$0x33]   ;;  %v1429_v24 = vld [vmem:[%s1906_s3 + $0x30] sm:$0xff]   ;;  %v179_v26 = vcombine.high %v177_v19, %v177_v19  ;;  %v1431_v28 = vld [vmem:[%s1906_s3 + $0x78] sm:$0xff]  }
   0x8   :  { %1251 = vmatprep.subr.bf16.mxu0 %v1417_v5  ;;  %1360 = vmatpush3.bf16.msra.mxu1 %v1424_v10  ;;  %v378_v27 = vsel %vm376_vm1, %v1434_v23, 0  ;;  %v1432_v29 = vld [vmem:[%s1906_s3 + $0x38] sm:$0xff]   ;;  %v1435_v31 = vld [vmem:[%s1908_s5] sm:$0xff]   ;;  %v186_v32 = vrot.slane %v177_v19, %v1663_v30  ;;  %v1436_v37 = vld [vmem:[%s1908_s5 + $0x8] sm:$0xff]  }
   0x9   :  { %1361 = vmatprep.subr.bf16.mxu1 %v1525_v2  ;;  %v193_v33 = vrot.slane %v179_v26, %v1663_v30  ;;  %v1437_v39 = vld [vmem:[%s1908_s5 + $0x10] sm:$0xff]   ;;  %v1438_v40 = vld [vmem:[%s1908_s5 + $0x18] sm:$0xff]  }
   0xa   :  { %v194_v34 = vcombine.high %v186_v32, %v186_v32  ;;  %v198_v36 = vpack.c.bf16 %v186_v32, %v186_v32 }
   0xb   :  { %1252 = vmatpush3.bf16.msra.mxu0 %v1418_v6  ;;  %v200_v35 = vpack.c.bf16 %v193_v33, %v193_v33 }
   0xc   :  { %1253 = vmatprep.subr.bf16.mxu0 %v1419_v7  ;;  %1362 = vmatpush3.bf16.msra.mxu1 %v1427_v12  ;;  %v199_v38 = vpack.c.bf16 %v194_v34, %v194_v34 }
   0xd   :  { %1363 = vmatprep.subr.bf16.mxu1 %v1525_v2 }
   0xe   :  { %412 = vmatprep.mubr.bf16.mxu0 %v199_v38 }
   0xf   :  { %1254 = vmatpush3.bf16.msra.mxu0 %v1420_v9 }
  0x10   :  { %1255 = vmatprep.subr.bf16.mxu0 %v1422_v11  ;;  %1364 = vmatpush3.bf16.msra.mxu1 %v1430_v17 }
  0x11   :  { %1365 = vmatprep.subr.bf16.mxu1 %v1525_v2 }
  0x13   :  { %1256 = vmatpush3.bf16.msra.mxu0 %v1423_v13 }
  0x14   :  { %1257 = vmatprep.subr.bf16.mxu0 %v1425_v14  ;;  %1366 = vmatpush3.bf16.msra.mxu1 %v378_v27 }
  0x15   :  { %1371 = vmatprep.subr.bf16.mxu1 %v1525_v2 }
  0x17   :  { %1258 = vmatpush3.bf16.msra.mxu0 %v1426_v15  ;;  %1368 = vmatmul.mubr.msk.bf16.vlgmr.msra.gmra.mrb[0].mxu1 %vm372_vm2, %v200_v35 }
  0x18   :  { %1259 = vmatprep.subr.bf16.mxu0 %v1428_v18  ;;  %1372 = vmatpush3.bf16.msra.mxu1 %v1435_v31 }
  0x19   :  { %1385 = vmatprep.mubr.msk.bf16.mxu1 %vm1526_vm0, %v1525_v2  ;;  %1373 = vmatprep.subr.bf16.mxu1 %v1525_v2 }
  0x1b   :  { %1260 = vmatpush3.bf16.msra.mxu0 %v1429_v24 }
  0x1c   :  { %1261 = vmatprep.subr.bf16.mxu0 %v1431_v28  ;;  %1374 = vmatpush3.bf16.msra.mxu1 %v1436_v37 }
  0x1d   :  { %1375 = vmatprep.subr.bf16.mxu1 %v1525_v2 }
  0x1f   :  { %1262 = vmatpush3.bf16.msra.mxu0 %v1432_v29 }
  0x20   :  { %1376 = vmatpush3.bf16.msra.mxu1 %v1437_v39 }
  0x21   :  { %1377 = vmatprep.subr.bf16.mxu1 %v1525_v2 }
  0x22   :  { %413 = vmatmul.mubr.bf16.vlgmr.msra.gmra.mrb[0].mxu0 %v198_v36 }
  0x24   :  { %1378 = vmatpush3.bf16.msra.mxu1 %v1438_v40 }
  0x25   :  { %1379 = vmatprep.subr.bf16.mxu1 %v1525_v2 }
  0x26   :  { %16 = vsyncpa [#allocation3], 0  ;;  %v1439_v41 = vld [vmem:[%s1908_s5 + $0x20] sm:$0xff]   ;;  %v1440_v42 = vld [vmem:[%s1908_s5 + $0x28] sm:$0xff]   ;;  %vm521_vm3 = vcmask 818176   ;;  %vm605_vm4 = vcmask 1045504  }
  0x27   :  { %v1441_v43 = vld [vmem:[%s1908_s5 + $0x30] ss:$0 sps:$4 sm:$0x33]   ;;  %v1442_v45 = vld [vmem:[%s1905_s2 + $0x40] sm:$0xff]   ;;  %v1444_v47 = vld [vmem:[%s1905_s2 + $0x48] sm:$0xff]   ;;  %vm601_vm5 = vcmask 490496  }
  0x28   :  { %1380 = vmatpush3.bf16.msra.mxu1 %v1439_v41  ;;  %v526_v44 = vsel %vm376_vm1, %v1441_v43, 0  ;;  %v1443_v46 = vld [vmem:[%s1905_s2] sm:$0xff]   ;;  %1288 = vmatprep.subr.bf16.mxu0 %v1442_v45  ;;  %v1445_v48 = vld [vmem:[%s1905_s2 + $0x8] sm:$0xff]   ;;  %v1446_v49 = vld [vmem:[%s1905_s2 + $0x50] sm:$0xff]   ;;  %vm1086_vm6 = vcmask 162816   ;;  %vm1139_vm7 = vcmask 17408  }
  0x29   :  { %1381 = vmatprep.subr.bf16.mxu1 %v1525_v2  ;;  %1289 = vmatpush3.bf16.msra.mxu0 %v1443_v46  ;;  %v1447_v50 = vld [vmem:[%s1905_s2 + $0x10] sm:$0xff]   ;;  %v1448_v51 = vld [vmem:[%s1905_s2 + $0x58] sm:$0xff]   ;;  %v1450_v53 = vld [vmem:[%s1905_s2 + $0x60] sm:$0xff]  }
  0x2a   :  { %1290 = vmatprep.subr.bf16.mxu0 %v1444_v47  ;;  %v1449_v52 = vld [vmem:[%s1905_s2 + $0x18] sm:$0xff]   ;;  %v1451_v54 = vld [vmem:[%s1905_s2 + $0x20] sm:$0xff]   ;;  %v1453_v55 = vld [vmem:[%s1905_s2 + $0x68] sm:$0xff]  }
  0x2b   :  { %v1454_v56 = vld [vmem:[%s1905_s2 + $0x28] sm:$0xff]   ;;  %v1456_v57 = vld [vmem:[%s1905_s2 + $0x70] sm:$0xff]   ;;  %v1156_v1 = vld [vmem:[%s1907_s4] ss:$0 sm:$0xff] }
  0x2c   :  { %1382 = vmatpush3.bf16.msra.mxu1 %v1440_v42  ;;  %v1457_v58 = vld [vmem:[%s1905_s2 + $0x30] sm:$0xff]   ;;  %v1452_v9 = vld [vmem:[%s1910_s7] sm:$0xff]   ;;  %v1455_v11 = vld [vmem:[%s1910_s7 + $0x8] sm:$0xff]  }
  0x2d   :  { %1383 = vmatprep.subr.bf16.mxu1 %v1525_v2  ;;  %1291 = vmatpush3.bf16.msra.mxu0 %v1445_v48  ;;  %v1458_v12 = vld [vmem:[%s1910_s7 + $0x10] sm:$0xff]   ;;  %v40_v13 = vld [vmem:[%s1903_s0] sm:$0xff]  ;;  %v1459_v15 = vld [vmem:[%s1905_s2 + $0x78] sm:$0xff]  }
  0x2e   :  { %1292 = vmatprep.subr.bf16.mxu0 %v1446_v49  ;;  %v51_v14 = vrot.slane %v40_v13, %v1663_v30  ;;  %v1460_v16 = vld [vmem:[%s1905_s2 + $0x38] sm:$0xff]   ;;  %v1462_v22 = vld [vmem:[%s1905_s2 + $0x140] sm:$0xff]   ;;  %v1466_v25 = vld [vmem:[%s1905_s2 + $0x148] sm:$0xff]  }
  0x2f   :  { %v1461_v18 = vld [vmem:[%s1910_s7 + $0x18] sm:$0x3f]   ;;  %v1463_v23 = vld [vmem:[%s1905_s2 + $0xc0] sm:$0xff]   ;;  %v1468_v26 = vld [vmem:[%s1905_s2 + $0x108] sm:$0xff]  }
  0x30   :  { %1384 = vmatpush3.bf16.msra.mxu1 %v526_v44  ;;  %v59_v17 = vcombine.high %v51_v14, %v51_v14  ;;  %v607_v20 = vsel %vm605_vm4, %v1461_v18, 0  ;;  %v75_v21 = vpack.c.bf16 %v51_v14, %v51_v14  ;;  %v1464_v24 = vld [vmem:[%s1905_s2 + $0x100] sm:$0xff]   ;;  %v1470_v27 = vld [vmem:[%s1905_s2 + $0x150] sm:$0xff]   ;;  %v1474_v29 = vld [vmem:[%s1905_s2 + $0x158] sm:$0xff]   ;;  %v44_v44 = vcombine.high %v40_v13, %v40_v13 }
  0x31   :  { %1389 = vmatprep.subr.bf16.mxu1 %v1525_v2  ;;  %1293 = vmatpush3.bf16.msra.mxu0 %v1447_v50  ;;  %v1472_v28 = vld [vmem:[%s1905_s2 + $0x110] sm:$0xff]   ;;  %v1476_v31 = vld [vmem:[%s1905_s2 + $0x118] sm:$0xff]   ;;  %v1478_v32 = vld [vmem:[%s1905_s2 + $0x160] sm:$0xff]  }
  0x32   :  { %1294 = vmatprep.subr.bf16.mxu0 %v1448_v51  ;;  %v76_v19 = vpack.c.bf16 %v59_v17, %v59_v17  ;;  %v1480_v33 = vld [vmem:[%s1905_s2 + $0x120] sm:$0xff]   ;;  %v1482_v34 = vld [vmem:[%s1905_s2 + $0x168] sm:$0xff]   ;;  %v1486_v36 = vld [vmem:[%s1905_s2 + $0x170] sm:$0xff]   ;;  %v58_v45 = vrot.slane %v44_v44, %v1663_v30 }
  0x33   :  { %v1484_v35 = vld [vmem:[%s1905_s2 + $0x128] sm:$0xff]   ;;  %v1488_v37 = vld [vmem:[%s1905_s2 + $0x130] sm:$0xff]   ;;  %v1490_v38 = vld [vmem:[%s1905_s2 + $0x178] sm:$0xff]  }
  0x34   :  { %969 = vmatprep.mubr.bf16.mxu0 %v76_v19  ;;  %v1155_v39 = vld.sshfl [vmem:[%s1903_s0 + $0x8] sm:$0x33 pattern:$0x76325410]  ;;  %v1492_v40 = vld [vmem:[%s1905_s2 + $0x138] sm:$0xff]   ;;  %v60_v48 = vcombine.high %v58_v45, %v58_v45  ;;  %v1495_v18 = vld [vmem:[%s1912_s9] sm:$0xff]  }
  0x35   :  { %1295 = vmatpush3.bf16.msra.mxu0 %v1449_v52  ;;  %v68_v41 = vcombine.high %v1155_v39, %v1155_v39  ;;  %v79_v43 = vpack.c.bf16 %v1155_v39, %v1155_v39  ;;  %v1179_v46 = vld [vmem:[%s1909_s6] ss:$0 sm:$0xff]  ;;  %v1467_v30 = vld [vmem:[%s1905_s2 + $0xc8] sm:$0xff]  }
  0x36   :  { %1296 = vmatprep.subr.bf16.mxu0 %v1450_v53  ;;  %v1496_v19 = vld [vmem:[%s1912_s9 + $0x8] ss:$0 sps:$4 sm:$0x33]  }
  0x37   :  { %v80_v42 = vpack.c.bf16 %v68_v41, %v68_v41 }
  0x39   :  { %1297 = vmatpush3.bf16.msra.mxu0 %v1451_v54  ;;  %v1465_v54 = vld [vmem:[%s1905_s2 + $0x80] sm:$0xff]  }
  0x3a   :  { %1298 = vmatprep.subr.bf16.mxu0 %v1453_v55  ;;  %v78_v55 = vpack.c.bf16 %v60_v48, %v60_v48 }
  0x3d   :  { %1299 = vmatpush3.bf16.msra.mxu0 %v1454_v56 }
  0x3e   :  { %1300 = vmatprep.subr.bf16.mxu0 %v1456_v57  ;;  %v1469_v57 = vld [vmem:[%s1905_s2 + $0x88] sm:$0xff]  }
  0x41   :  { %1301 = vmatpush3.bf16.msra.mxu0 %v1457_v58  ;;  %v1471_v58 = vld [vmem:[%s1905_s2 + $0xd0] sm:$0xff]  }
  0x42   :  { %1302 = vmatprep.subr.bf16.mxu0 %v1459_v15 }
  0x45   :  { %1303 = vmatpush3.bf16.msra.mxu0 %v1460_v16 }
  0x46   :  { %1332 = vmatprep.subr.bf16.mxu0 %v1462_v22 }
  0x48   :  { %970 = vmatmul.mubr.bf16.vlgmr.msra.gmra.mrb[4].mxu0 %v75_v21 }
  0x49   :  { %1333 = vmatpush3.bf16.msra.mxu0 %v1464_v24  ;;  %1049 = vmatprep.mubr.bf16.mxu0 %v80_v42 }
  0x4a   :  { %1334 = vmatprep.subr.bf16.mxu0 %v1466_v25 }
  0x4d   :  { %1335 = vmatpush3.bf16.msra.mxu0 %v1468_v26 }
  0x4e   :  { %1336 = vmatprep.subr.bf16.mxu0 %v1470_v27 }
  0x51   :  { %1337 = vmatpush3.bf16.msra.mxu0 %v1472_v28 }
  0x52   :  { %1338 = vmatprep.subr.bf16.mxu0 %v1474_v29 }
  0x55   :  { %1339 = vmatpush3.bf16.msra.mxu0 %v1476_v31 }
  0x56   :  { %1340 = vmatprep.subr.bf16.mxu0 %v1478_v32 }
  0x59   :  { %1341 = vmatpush3.bf16.msra.mxu0 %v1480_v33 }
  0x5a   :  { %1342 = vmatprep.subr.bf16.mxu0 %v1482_v34 }
  0x5d   :  { %1343 = vmatpush3.bf16.msra.mxu0 %v1484_v35 }
  0x5e   :  { %1344 = vmatprep.subr.bf16.mxu0 %v1486_v36 }
  0x61   :  { %1345 = vmatpush3.bf16.msra.mxu0 %v1488_v37  ;;  %v1242_v37 = vld [vmem:[%s1913_s10] ss:$0 sm:$0xff] }
  0x62   :  { %1346 = vmatprep.subr.bf16.mxu0 %v1490_v38 }
  0x65   :  { %1347 = vmatpush3.bf16.msra.mxu0 %v1492_v40 }
  0x68   :  { %1050 = vmatmul.mubr.bf16.vlgmr.msra.gmra.mrb[8].mxu0 %v79_v43 }
  0xea   :  { %v454_v59 = vpop.f32.mrb[0].mxu1 }
  0xeb   :  { %v1369_v60 = vpop.f32.mrb[1].mxu1 }
  0xec   :  { %v457_v61 = vpop.f32.mrb[2].mxu1  ;;  %v1475_v60 = vld [vmem:[%s1905_s2 + $0xd8] sm:$0xff]  }
  0xed   :  { %v1370_v63 = vpop.f32.mrb[3].mxu1  ;;  %v1477_v61 = vld [vmem:[%s1905_s2 + $0x98] sm:$0xff]  }
  0xee   :  { %v1481_v63 = vld [vmem:[%s1905_s2 + $0xa0] sm:$0xff]  }
  0xf5   :  { %v1263_v62 = vpop.f32.mrb[0].mxu0 }
  0xf6   :  { %v1264_v0 = vpop.f32.mrb[1].mxu0 }
  0xf7   :  { %v1265_v3 = vadd.f32 %v1264_v0, %v1263_v62  ;;  %v1266_v4 = vpop.f32.mrb[2].mxu0  ;;  %v1479_v62 = vld [vmem:[%s1905_s2 + $0xe0] sm:$0xff]   ;;  %v1483_v0 = vld [vmem:[%s1905_s2 + $0xe8] sm:$0xff]  }
  0xf8   :  { %v1267_v5 = vpop.f32.mrb[3].mxu0  ;;  %v1489_v4 = vld [vmem:[%s1905_s2 + $0xb0] sm:$0xff]  }
  0xf9   :  { %v415_v6 = vadd.f32 %v1265_v3, %v1156_v1  ;;  %v1485_v1 = vld [vmem:[%s1905_s2 + $0xa8] sm:$0xff]   ;;  %v1487_v3 = vld [vmem:[%s1905_s2 + $0xf0] sm:$0xff]   ;;  %v1491_v5 = vld [vmem:[%s1905_s2 + $0xf8] sm:$0xff]  }
  0xfb   :  { %v455_v7 = vadd.f32 %v454_v59, %v415_v6  ;;  %v1473_v59 = vld [vmem:[%s1905_s2 + $0x90] sm:$0xff]   ;;  %v1493_v6 = vld [vmem:[%s1905_s2 + $0xb8] sm:$0xff]  }
  0xfd   :  { %v460_v8 = vmax.f32 %v455_v7, 0.0  ;;  %v77_v7 = vpack.c.bf16 %v58_v45, %v58_v45 }
  0xff   :  { %v461_v10 = vpack.c.bf16 %v460_v8, %v460_v8 }
 0x101   :  { %1386 = vmatmul.mubr.msk.bf16.vlgmr.msra.gmra.mrb[4].mxu1 %vm521_vm3, %v461_v10 }
 0x102   :  { %1390 = vmatpush3.bf16.msra.mxu1 %v1452_v9  ;;  %1397 = vmatprep.mubr.msk.bf16.mxu1 %vm1526_vm0, %v1525_v2 }
 0x103   :  { %1391 = vmatprep.subr.bf16.mxu1 %v1525_v2 }
 0x106   :  { %1392 = vmatpush3.bf16.msra.mxu1 %v1455_v11 }
 0x107   :  { %1393 = vmatprep.subr.bf16.mxu1 %v1525_v2 }
 0x10a   :  { %1394 = vmatpush3.bf16.msra.mxu1 %v1458_v12 }
 0x10b   :  { %1395 = vmatprep.subr.bf16.mxu1 %v1525_v2 }
 0x10e   :  { %1396 = vmatpush3.bf16.msra.mxu1 %v607_v20  ;;  %v1091_v20 = vsel %vm376_vm1, %v1496_v19, 0 }
 0x10f   :  { %1310 = vmatprep.subr.bf16.mxu1 %v1463_v23 }
 0x11b   :  { %v1304_v8 = vpop.f32.mrb[4].mxu0 }
 0x11c   :  { %v1305_v9 = vpop.f32.mrb[5].mxu0 }
 0x11d   :  { %v1306_v10 = vadd.f32 %v1305_v9, %v1304_v8  ;;  %v1307_v11 = vpop.f32.mrb[6].mxu0 }
 0x11e   :  { %v1308_v12 = vpop.f32.mrb[7].mxu0 }
 0x13b   :  { %v1348_v13 = vpop.f32.mrb[8].mxu0 }
 0x13c   :  { %v1349_v14 = vpop.f32.mrb[9].mxu0 }
 0x13d   :  { %v1350_v15 = vadd.f32 %v1349_v14, %v1348_v13  ;;  %v1351_v16 = vpop.f32.mrb[10].mxu0 }
 0x13e   :  { %v1352_v17 = vpop.f32.mrb[11].mxu0 }
 0x1d4   :  { %v562_v47 = vpop.f32.mrb[4].mxu1 }
 0x1d5   :  { %v563_v49 = vadd.f32 %v1179_v46, %v562_v47  ;;  %v1387_v50 = vpop.f32.mrb[5].mxu1 }
 0x1d6   :  { %v565_v51 = vpop.f32.mrb[6].mxu1 }
 0x1d7   :  { %v568_v52 = vmax.f32 %v563_v49, 0.0  ;;  %v1388_v53 = vpop.f32.mrb[7].mxu1 }
 0x1d9   :  { %v569_v56 = vpack.c.bf16 %v568_v52, %v568_v52 }
 0x1db   :  { %1398 = vmatmul.mubr.msk.bf16.vlgmr.msra.gmra.mrb[8].mxu1 %vm601_vm5, %v569_v56 }
 0x1dc   :  { %1311 = vmatpush3.bf16.msra.mxu1 %v1465_v54  ;;  %1009 = vmatprep.mubr.bf16.mxu1 %v78_v55 }
 0x1dd   :  { %1312 = vmatprep.subr.bf16.mxu1 %v1467_v30 }
 0x1e0   :  { %1313 = vmatpush3.bf16.msra.mxu1 %v1469_v57 }
 0x1e1   :  { %1314 = vmatprep.subr.bf16.mxu1 %v1471_v58 }
 0x1e4   :  { %1315 = vmatpush3.bf16.msra.mxu1 %v1473_v59 }
 0x1e5   :  { %1316 = vmatprep.subr.bf16.mxu1 %v1475_v60 }
 0x1e8   :  { %1317 = vmatpush3.bf16.msra.mxu1 %v1477_v61 }
 0x1e9   :  { %1318 = vmatprep.subr.bf16.mxu1 %v1479_v62 }
 0x1ec   :  { %1319 = vmatpush3.bf16.msra.mxu1 %v1481_v63 }
 0x1ed   :  { %1320 = vmatprep.subr.bf16.mxu1 %v1483_v0 }
 0x1f0   :  { %1321 = vmatpush3.bf16.msra.mxu1 %v1485_v1 }
 0x1f1   :  { %1322 = vmatprep.subr.bf16.mxu1 %v1487_v3 }
 0x1f4   :  { %1323 = vmatpush3.bf16.msra.mxu1 %v1489_v4 }
 0x1f5   :  { %1324 = vmatprep.subr.bf16.mxu1 %v1491_v5 }
 0x1f8   :  { %1325 = vmatpush3.bf16.msra.mxu1 %v1493_v6 }
 0x1f9   :  { %1401 = vmatprep.subr.bf16.mxu1 %v1525_v2 }
 0x1fb   :  { %1010 = vmatmul.mubr.bf16.vlgmr.msra.gmra.mrb[12].mxu1 %v77_v7 }
 0x1fc   :  { %1405 = vmatprep.mubr.msk.bf16.mxu1 %vm1526_vm0, %v1525_v2  ;;  %1402 = vmatpush3.bf16.msra.mxu1 %v1495_v18 }
 0x1fd   :  { %1403 = vmatprep.subr.bf16.mxu1 %v1525_v2  ;;  %v1241_v2 = vld [vmem:[%s1911_s8] ss:$0 sm:$0xff]  ;;  %s1528_s8 = smov [#allocation2]  }
 0x1fe   :  { %s1147_s13 = sshll.u32 %s1528_s8, 4  ;;  %s1148_s13 = int_to_ptr.vmem [resolvable:$true] %s1147_s13 }
 0x1ff   :  { %s1501_s14 = scalar_lea.vmem %s1148_s13, 32  ;;  %p1506_p1 = scmp.lt.s32.totalorder %s1148_s13, %s1148_s13 }
 0x200   :  { %1404 = vmatpush3.bf16.msra.mxu1 %v1091_v20  ;;  %p1502_p0 = scmp.ne.s32.totalorder %s1148_s13, %s1501_s14  ;;  %p1507_p2 = scmp.lt.s32.totalorder %s1501_s14, %s1501_s14 }
 0x202   :  { %p1508_p3 = por %p1507_p2, %p1506_p1 }
 0x204   :  { %p1509_p4 = pnand %p1508_p3, %p1502_p0 }
 0x2ae   :  { %v643_v21 = vpop.f32.mrb[8].mxu1 }
 0x2af   :  { %v972_v22 = vadd.f32 %v1306_v10, %v643_v21  ;;  %v1399_v23 = vpop.f32.mrb[9].mxu1 }
 0x2b0   :  { %v646_v24 = vpop.f32.mrb[10].mxu1 }
 0x2b1   :  { %v1400_v25 = vpop.f32.mrb[11].mxu1 }
 0x2ce   :  { %v1326_v26 = vpop.f32.mrb[12].mxu1 }
 0x2cf   :  { %v1327_v27 = vpop.f32.mrb[13].mxu1 }
 0x2d0   :  { %v1328_v28 = vadd.f32 %v1327_v27, %v1326_v26  ;;  %v1329_v29 = vpop.f32.mrb[14].mxu1 }
 0x2d1   :  { %v1330_v31 = vpop.f32.mrb[15].mxu1 }
 0x2d2   :  { %v1012_v32 = vadd.f32 %v1328_v28, %v972_v22 }
 0x2d4   :  { %v1052_v33 = vadd.f32 %v1350_v15, %v1012_v32 }
 0x2d6   :  { %v1064_v34 = vadd.f32 %v1241_v2, %v1052_v33 }
 0x2d8   :  { %v1065_v35 = vmax.f32 %v1064_v34, 0.0 }
 0x2da   :  { %v1066_v36 = vpack.c.bf16 %v1065_v35, %v1065_v35 }
 0x2dc   :  { %1406 = vmatmul.mubr.msk.bf16.vlgmr.msra.gmra.mrb[16].mxu1 %vm1086_vm6, %v1066_v36 }
 0x3af   :  { %v1127_v38 = vpop.f32.mrb[16].mxu1 }
 0x3b0   :  { %v1128_v39 = vadd.f32 %v1242_v37, %v1127_v38  ;;  %v1407_v40 = vpop.f32.mrb[17].mxu1 }
 0x3b1   :  { %v1130_v41 = vpop.f32.mrb[18].mxu1 }
 0x3b2   :  { %v1246_v42 = vmul.f32 -1.442695, %v1128_v39  ;;  %v1408_v43 = vpop.f32.mrb[19].mxu1 }
 0x3b4   :  { %1497 = vpow2.f32 %v1246_v42 }
 0x3be   :  { %v1498_v44 = vpop.eup %1497 }
 0x3bf   :  { %v1136_v45 = vadd.f32 1.0, %v1498_v44 }
 0x3c1   :  { %1499 = vrcp.f32 %v1136_v45 }
 0x3cb   :  { %v1500_v46 = vpop.eup %1499 }
 0x3cc   :  { %1140 = vst.msk [vmem:[#allocation2] sm:$0x3] %vm1139_vm7, %v1500_v46 }
 0x3cd   :  { %1512 = shalt.err (!%p1509_p4)
}
 0x3ce   :  { %s1513_s16 = scalar_lea.hbm %s1914_s11, 32 }
 0x3cf   :  { %p1514_p5 = scmp.ne.s32.totalorder %s1914_s11, %s1513_s16  ;;  %p1517_p6 = scmp.lt.u32.totalorder %s1513_s16, %s1914_s11 }
 0x3d1   :  { %p1519_p7 = pnand %p1517_p6, %p1514_p5 }
 0x3d3   :  { %1522 = shalt.err (!%p1519_p7)
}
 0x3d4   :  { %1150 = dma.vmem_to_hbm [thread:$0]  %s1148_s13, 32, %s1914_s11, [#allocation3]  }
 0x3d5   :  { %1523 = dma.done.wait [#allocation3], 32  }
 0x3d6   :  { %1524 = vsyncadd [#allocation3], 4294967264 }
 0x3d7   :  { %1154 = vsyncpa [#allocation3], 1 }

</bundles_post_ra>
